<compile_context>
chip_gen: v7x
topology: tpu7x:2x2x1
jax: 0.10.0
libtpu: 0.0.40
codegen_flags: <defaults>
</compile_context>

<pallas_src>
import functools

import jax
import jax.numpy as jnp
from jax.experimental import pallas as pl
from jax.experimental.pallas import tpu as pltpu

IN_F = 2 * 2 ** 3      # 16
HID_F = 2 * 2 ** 4     # 32
OUT_F = 2 * 2 ** 3     # 16
LANE = 128             # TPU lane width
SLAB_ROWS = 24         # rows 0:16 = fused W (lane-padded), row 16 = fused bias


def fused_mlp_kernel(x_ref, slab_ref, o_ref):
    # slab layout (f32 [24, 128]):
    #   rows 0:16, cols 0:16  -> fused weight  W = W1 @ W2   (zero elsewhere)
    #   row  16,   cols 0:16  -> fused bias    b = b1 @ W2 + b2
    w = slab_ref[0:IN_F, :]              # (16, 128), lane-padded with zeros
    b = slab_ref[IN_F:IN_F + 1, :]       # (1, 128)
    y = jnp.dot(x_ref[...], w, preferred_element_type=jnp.float32) + b
    o_ref[...] = y.astype(o_ref.dtype)   # (TILE_B, 128) lane-dense, unmasked stores


def _build_slab(w1, b1, w2, b2):
    # Offline algebraic fusion of the two Linear layers (no nonlinearity between them).
    w_fused = w1 @ w2                    # [16, 16]
    b_fused = b1 @ w2 + b2               # [1, 16]
    slab = jnp.zeros((SLAB_ROWS, LANE), jnp.float32)
    slab = slab.at[0:IN_F, 0:OUT_F].set(w_fused)
    slab = slab.at[IN_F, 0:OUT_F].set(b_fused[0])
    return slab


@functools.partial(jax.jit, static_argnames=("tile_b",))
def mlp_forward(x, w1, b1, w2, b2, *, tile_b=512):
    B, in_f = x.shape
    assert in_f == IN_F
    slab = _build_slab(w1, b1, w2, b2)

    # Pad batch to a multiple of the sublane width (8) and of the batch tile.
    b_pad = ((B + 7) // 8) * 8
    tb = min(tile_b, b_pad)
    b_pad = ((b_pad + tb - 1) // tb) * tb
    x_pad = jnp.zeros((b_pad, IN_F), jnp.float32).at[:B].set(x.astype(jnp.float32))

    out = pl.pallas_call(
        fused_mlp_kernel,
        out_shape=jax.ShapeDtypeStruct((b_pad, LANE), jnp.float32),
        grid=(b_pad // tb,),
        in_specs=[
            pl.BlockSpec((tb, IN_F), lambda i: (i, 0)),          # x tile, scales with B
            pl.BlockSpec((SLAB_ROWS, LANE), lambda i: (0, 0)),   # params, stay resident
        ],
        out_specs=pl.BlockSpec((tb, LANE), lambda i: (i, 0)),    # lane-dense output
        compiler_params=pltpu.CompilerParams(
            dimension_semantics=("parallel",),
        ),
    )(x_pad, slab)
    return out[:B, :OUT_F]


def init_params(key):
    # Deterministic init mimicking nn.Linear default: U(-1/sqrt(fan_in), 1/sqrt(fan_in)).
    # Weights stored as [in, out] (transposed from PyTorch's [out, in]).
    k1, k2, k3, k4 = jax.random.split(key, 4)
    lim1 = 1.0 / jnp.sqrt(float(IN_F))
    lim2 = 1.0 / jnp.sqrt(float(HID_F))
    w1 = jax.random.uniform(k1, (IN_F, HID_F), jnp.float32, -lim1, lim1)
    b1 = jax.random.uniform(k2, (1, HID_F), jnp.float32, -lim1, lim1)
    w2 = jax.random.uniform(k3, (HID_F, OUT_F), jnp.float32, -lim2, lim2)
    b2 = jax.random.uniform(k4, (1, OUT_F), jnp.float32, -lim2, lim2)
    return w1, b1, w2, b2


if __name__ == "__main__":
    key = jax.random.PRNGKey(0)
    pkey, xkey = jax.random.split(key)
    w1, b1, w2, b2 = init_params(pkey)

    # batch=2, in_features=16 (as implied by Linear(16, 32))
    x = jax.random.normal(xkey, (2, IN_F), jnp.float32)

    out = mlp_forward(x, w1, b1, w2, b2)
    out = jax.block_until_ready(out)

    # Pure-JAX (unfused) reference check
    ref = (x @ w1 + b1) @ w2 + b2
    assert out.shape == (2, OUT_F)
    assert jnp.allclose(out, ref, atol=1e-4, rtol=1e-4)

    print("KERNEL_OK")
</pallas_src>

<mosaic_0001>
module attributes {stable_mosaic.version = 11 : i64} {
  func.func @fused_mlp_kernel(%arg0: i32, %arg1: memref<8x16xf32, #tpu.memory_space<vmem>>, %arg2: memref<24x128xf32, #tpu.memory_space<vmem>>, %arg3: memref<8x128xf32, #tpu.memory_space<vmem>>) attributes {dimension_semantics = [#tpu.dimension_semantics<parallel>], iteration_bounds = array<i64: 1>, scalar_prefetch = 0 : i64, scratch_operands = 0 : i64, tpu.core_type = #tpu.core_type<tc>, window_params = [{transform_indices = @transform_0, window_bounds = array<i64: 8, 16>}, {pipeline_mode = #tpu.pipeline_mode<synchronous>, transform_indices = @transform_1, window_bounds = array<i64: 24, 128>}, {transform_indices = @transform_2, window_bounds = array<i64: 8, 128>}]} {
    %c0 = arith.constant 0 : index
    %c0_0 = arith.constant 0 : index
    %0 = vector.load %arg2[%c0, %c0_0] : memref<24x128xf32, #tpu.memory_space<vmem>>, vector<16x128xf32>
    %c16 = arith.constant 16 : index
    %c0_1 = arith.constant 0 : index
    %1 = vector.load %arg2[%c16, %c0_1] : memref<24x128xf32, #tpu.memory_space<vmem>>, vector<1x128xf32>
    %c0_2 = arith.constant 0 : index
    %c0_3 = arith.constant 0 : index
    %2 = vector.load %arg1[%c0_2, %c0_3] : memref<8x16xf32, #tpu.memory_space<vmem>>, vector<8x16xf32>
    %cst = arith.constant dense<0.000000e+00> : vector<8x128xf32>
    %3 = tpu.matmul %2, %0, %cst {dimension_numbers = #tpu.dot_dimension_numbers<[1], [0], [0], [1], [0, 0, 1, 1], [], []>} : vector<8x16xf32>, vector<16x128xf32>, vector<8x128xf32> -> vector<8x128xf32>
    %4 = vector.broadcast %1 : vector<1x128xf32> to vector<8x128xf32>
    %5 = arith.addf %3, %4 : vector<8x128xf32>
    %c0_4 = arith.constant 0 : index
    %c0_5 = arith.constant 0 : index
    %6 = vector.load %arg3[%c0_4, %c0_5] : memref<8x128xf32, #tpu.memory_space<vmem>>, vector<8x128xf32>
    tpu.vector_store %arg3[%c0_4, %c0_5], %5 {strides = array<i32>} : memref<8x128xf32, #tpu.memory_space<vmem>>, vector<8x128xf32>,
    return
  }
  func.func @transform_0(%arg0: i32) -> (i32, i32) {
    %c0_i32 = arith.constant 0 : i32
    %c0_i32_0 = arith.constant 0 : i32
    return %arg0, %c0_i32 : i32, i32
  }
  func.func @transform_1(%arg0: i32) -> (i32, i32) {
    %c0_i32 = arith.constant 0 : i32
    %c0_i32_0 = arith.constant 0 : i32
    %c0_i32_1 = arith.constant 0 : i32
    return %c0_i32, %c0_i32_0 : i32, i32
  }
  func.func @transform_2(%arg0: i32) -> (i32, i32) {
    %c0_i32 = arith.constant 0 : i32
    %c0_i32_0 = arith.constant 0 : i32
    return %arg0, %c0_i32 : i32, i32
  }
}

</mosaic_0001>

<bundles_post_ra>
// kernel: mlp_forward.1
= control target key start
LH: loop header
LB: loop body
LE: loop exit
PB: predicated region body
PF: predicated region fallthrough
CT: control target
= control target key end

     0   :  { %v116_v0 = vmov 0.0|0.0   ;;  %vm117_vm0 = vmmov 0   ;;  %v118_v3 = vmov 0.0   ;;  %vm19_vm1 = vcmask 130048   ;;  %s149_s1 = inlined_call_operand.vmem [shape: f32[24,128], index: 1, kind: input, shape index: {}]   ;;  %s150_s0 = inlined_call_operand.vmem [shape: f32[8,16], index: 0, kind: input, shape index: {}]   ;;  %s151_s2 = inlined_call_operand.vmem [shape: f32[8,128], index: 2, kind: output, shape index: {}]  }
   0x1   :  { %110 = vmatprep.subr.bf16.mxu0 %v116_v0  ;;  %v11_v1 = vld [vmem:[%s149_s1] sm:$0xff]  ;;  %v12_v2 = vld [vmem:[%s149_s1 + $0x8] sm:$0xff]  ;;  %107 = vmatprep.mubr.msk.f32.mxu0 %vm117_vm0, %v118_v3  ;;  %v98_v6 = vld [vmem:[%s149_s1 + $0x10] ss:$0 sm:$0xff] }
   0x2   :  { %v111_v4 = vpack.c.bf16 %v12_v2, %v11_v1  ;;  %v14_v5 = vld [vmem:[%s150_s0] sm:$0xff] }
   0x4   :  { %112 = vmatpush3.bf16.msra.mxu0 %v111_v4 }
   0x7   :  { %108 = vmatmul.mubr.msk.f32.vlgmr.msra.gmra.mrb[0].mxu0 %vm19_vm1, %v14_v5 }
  0xda   :  { %v89_v7 = vpop.f32.mrb[0].mxu0 }
  0xdb   :  { %v90_v8 = vadd.f32 %v98_v6, %v89_v7  ;;  %v109_v9 = vpop.f32.mrb[1].mxu0 }
  0xdd   :  { %93 = vst [vmem:[%s151_s2] sm:$0xff] %v90_v8 }

</bundles_post_ra>
